<compile_context>
chip_gen: v6e
topology: v6e:2x2x1
jax: 0.10.0
libtpu: 0.0.40
codegen_flags: <defaults>
</compile_context>

<pallas_src>
import functools

import jax
import jax.numpy as jnp
from jax.experimental import pallas as pl
from jax.experimental.pallas import tpu as pltpu


def _round_up(v: int, m: int) -> int:
    return -(-v // m) * m


def _pick_tile(dim: int, cap: int, align: int) -> int:
    """Full (aligned) dim if it fits under the cap, else the cap rounded down
    to the alignment.  Guarantees the tile is `align`-aligned."""
    full = _round_up(dim, align)
    if full <= cap:
        return full
    return max(align, (cap // align) * align)


def _maybe_pad2(a, rows: int, cols: int):
    pr, pc = rows - a.shape[0], cols - a.shape[1]
    if pr or pc:
        a = jnp.pad(a, ((0, pr), (0, pc)))
    return a


# ----------------------------- kernels --------------------------------------

def _cond_linear_kernel_fused(x_ref, w_ref, b_ref, g_ref, o_ref):
    """Accumulate x @ W.T directly into the resident f32 output block.

    x_ref: (tm, tk) compute dtype; w_ref: (tn, tk) compute dtype (un-transposed,
    contraction on axis 1 -> trans_b on the MXU, no per-step vxpose);
    b_ref: (1, tn) f32; g_ref: (tm, tn) compute dtype; o_ref: (tm, tn) f32.
    """
    k = pl.program_id(2)

    @pl.when(k == 0)
    def _init():
        o_ref[...] = jnp.zeros_like(o_ref)

    o_ref[...] += jax.lax.dot_general(
        x_ref[...], w_ref[...],
        dimension_numbers=(((1,), (1,)), ((), ())),
        preferred_element_type=jnp.float32)

    @pl.when(k == pl.num_programs(2) - 1)
    def _finalize():
        o_ref[...] = (o_ref[...] + b_ref[...]) * g_ref[...].astype(jnp.float32)


def _cond_linear_kernel_scratch(x_ref, w_ref, b_ref, g_ref, o_ref, acc_ref):
    """Same, but with an f32 VMEM accumulator (used when output dtype != f32)."""
    k = pl.program_id(2)

    @pl.when(k == 0)
    def _init():
        acc_ref[...] = jnp.zeros_like(acc_ref)

    acc_ref[...] += jax.lax.dot_general(
        x_ref[...], w_ref[...],
        dimension_numbers=(((1,), (1,)), ((), ())),
        preferred_element_type=jnp.float32)

    @pl.when(k == pl.num_programs(2) - 1)
    def _finalize():
        out = (acc_ref[...] + b_ref[...]) * g_ref[...].astype(jnp.float32)
        o_ref[...] = out.astype(o_ref.dtype)


# ----------------------------- wrapper ---------------------------------------

@functools.partial(
    jax.jit,
    static_argnames=("compute_dtype", "out_dtype", "tm", "tn", "tk"))
def conditional_linear(x, y, weight, bias, embed_weight, *,
                       compute_dtype=jnp.float32, out_dtype=jnp.float32,
                       tm=512, tn=512, tk=1024):
    """x: (B, num_in), y: (B,) int, weight: (num_out, num_in),
    bias: (num_out,), embed_weight: (n_steps, num_out) -> (B, num_out)."""
    B, num_in = x.shape
    num_out, _ = weight.shape
    lane = 128
    csize = jnp.dtype(compute_dtype).itemsize
    osize = jnp.dtype(out_dtype).itemsize
    sub = max(8, 32 // csize)          # sublane granularity for the compute dtype

    # ---- tile selection ------------------------------------------------------
    # tm covers the whole padded batch when it fits under the cap -> the weight
    # is streamed from HBM exactly once (Bp // tm == 1).
    tm = _pick_tile(B, tm, sub)
    tn = _pick_tile(num_out, tn, lane)
    tk = _pick_tile(num_in, tk, lane)
    Bp = _round_up(B, tm)
    Np = _round_up(num_out, tn)
    Kp = _round_up(num_in, tk)

    # ---- operand prep: cast + pad only when needed ---------------------------
    # (For repeated calls the static params weight/bias/embed could be pre-cast
    #  and pre-padded once outside the hot path; with aligned shapes these pads
    #  are no-ops.)
    xp = _maybe_pad2(x.astype(compute_dtype), Bp, Kp)
    wp = _maybe_pad2(weight.astype(compute_dtype), Np, Kp)
    bp = _maybe_pad2(bias.astype(jnp.float32).reshape(1, num_out), 1, Np)
    # Pad the embed table's num_out axis first, then gather: gamma is written
    # directly at the padded width (single copy), and streamed in compute dtype.
    # TODO(synk): out-of-range y is clamped by jnp.take rather than raising as
    # torch.nn.Embedding would.
    ep = _maybe_pad2(embed_weight.astype(compute_dtype),
                     embed_weight.shape[0], Np)
    gamma = jnp.take(ep, y.astype(jnp.int32), axis=0)          # (B, Np)
    gp = _maybe_pad2(gamma, Bp, Np)

    # Grid order (out-tile j, batch-tile i, k): k innermost for the resident
    # output/accumulator; since tm usually covers the batch, n_i == 1 and the
    # (j, k) weight block is fetched exactly once overall.
    grid = (Np // tn, Bp // tm, Kp // tk)
    n_j, n_i, n_k = grid

    # ---- advisory cost (accounts for re-streaming) ---------------------------
    cost = pl.CostEstimate(
        flops=2 * Bp * Kp * Np + 3 * Bp * Np,
        transcendentals=0,
        bytes_accessed=int(xp.size * csize * n_j        # x re-read per out-tile
                           + wp.size * csize * n_i      # W re-read per batch-tile
                           + bp.size * 4
                           + gp.size * csize
                           + Bp * Np * osize))

    # ---- VMEM budget (double-buffered inputs + output (+ scratch)) ----------
    use_scratch = jnp.dtype(out_dtype) != jnp.dtype(jnp.float32)
    est_vmem = (2 * (tm * tk + tn * tk + tm * tn) * csize   # x, W, gamma (x2 buf)
                + 2 * tn * 4                                # bias
                + 2 * tm * tn * osize                       # output
                + (tm * tn * 4 if use_scratch else 0))      # acc scratch
    vmem_limit = min(64 << 20, max(32 << 20, int(est_vmem * 1.5)))

    kernel = _cond_linear_kernel_scratch if use_scratch else _cond_linear_kernel_fused
    scratch = [pltpu.VMEM((tm, tn), jnp.float32)] if use_scratch else []

    out_p = pl.pallas_call(
        kernel,
        out_shape=jax.ShapeDtypeStruct((Bp, Np), out_dtype),
        grid_spec=pltpu.PrefetchScalarGridSpec(
            num_scalar_prefetch=0,
            grid=grid,
            in_specs=[
                pl.BlockSpec((tm, tk), lambda j, i, k: (i, k)),   # x
                pl.BlockSpec((tn, tk), lambda j, i, k: (j, k)),   # weight
                pl.BlockSpec((1, tn), lambda j, i, k: (0, j)),    # bias
                pl.BlockSpec((tm, tn), lambda j, i, k: (i, j)),   # gamma
            ],
            out_specs=pl.BlockSpec((tm, tn), lambda j, i, k: (i, j)),
            scratch_shapes=scratch,
        ),
        compiler_params=pltpu.CompilerParams(
            dimension_semantics=("parallel", "parallel", "arbitrary"),
            vmem_limit_bytes=vmem_limit),
        cost_estimate=cost,
    )(xp, wp, bp, gp)

    if Bp == B and Np == num_out:
        return out_p
    return out_p[:B, :num_out]


if __name__ == "__main__":
    # Small shapes consistent with the module's forward.
    B, num_in, num_out, n_steps = 8, 32, 32, 16

    key = jax.random.PRNGKey(0)
    k_x, k_y, k_w, k_b, k_e = jax.random.split(key, 5)

    # Deterministic parameter init (mimics nn.Linear default + embed.uniform_()).
    bound = 1.0 / jnp.sqrt(jnp.float32(num_in))
    weight = jax.random.uniform(k_w, (num_out, num_in), jnp.float32, -bound, bound)
    bias = jax.random.uniform(k_b, (num_out,), jnp.float32, -bound, bound)
    embed_weight = jax.random.uniform(k_e, (n_steps, num_out), jnp.float32, 0.0, 1.0)

    x = jax.random.normal(k_x, (B, num_in), jnp.float32)
    y = jax.random.randint(k_y, (B,), 0, n_steps, jnp.int32)

    # Reference in plain JAX.
    ref = (x @ weight.T + bias) * embed_weight[y]

    # f32 MXU path (matches the f32 PyTorch reference; v5e-friendly).
    out_f32 = jax.block_until_ready(
        conditional_linear(x, y, weight, bias, embed_weight))
    assert out_f32.shape == (B, num_out)
    assert jnp.allclose(out_f32, ref, atol=1e-5, rtol=1e-5), "f32 mismatch"

    # bf16-operand MXU fast path (v6e/v7x); f32 accumulate + f32 epilogue.
    out_bf16c = jax.block_until_ready(
        conditional_linear(x, y, weight, bias, embed_weight,
                           compute_dtype=jnp.bfloat16))
    assert jnp.allclose(out_bf16c, ref, atol=5e-2, rtol=5e-2), "bf16-compute mismatch"

    # bf16 output writeback (halves the output stream; accumulate stays f32).
    out_bf16o = jax.block_until_ready(
        conditional_linear(x, y, weight, bias, embed_weight,
                           compute_dtype=jnp.bfloat16, out_dtype=jnp.bfloat16))
    assert out_bf16o.dtype == jnp.bfloat16
    assert jnp.allclose(out_bf16o.astype(jnp.float32), ref,
                        atol=5e-2, rtol=5e-2), "bf16-out mismatch"

    print("KERNEL_OK")
</pallas_src>

<mosaic_0001>
module attributes {stable_mosaic.version = 11 : i64} {
  func.func @_cond_linear_kernel_fused(%arg0: i32, %arg1: i32, %arg2: i32, %arg3: memref<8x128xf32, #tpu.memory_space<vmem>>, %arg4: memref<128x128xf32, #tpu.memory_space<vmem>>, %arg5: memref<1x128xf32, #tpu.memory_space<vmem>>, %arg6: memref<8x128xf32, #tpu.memory_space<vmem>>, %arg7: memref<8x128xf32, #tpu.memory_space<vmem>>) attributes {dimension_semantics = [#tpu.dimension_semantics<parallel>, #tpu.dimension_semantics<parallel>, #tpu.dimension_semantics<arbitrary>], iteration_bounds = array<i64: 1, 1, 1>, scalar_prefetch = 0 : i64, scratch_operands = 0 : i64, tpu.core_type = #tpu.core_type<tc>, window_params = [{transform_indices = @transform_0, window_bounds = array<i64: 8, 128>}, {transform_indices = @transform_1, window_bounds = array<i64: 128, 128>}, {transform_indices = @transform_2, window_bounds = array<i64: 1, 128>}, {transform_indices = @transform_3, window_bounds = array<i64: 8, 128>}, {transform_indices = @transform_4, window_bounds = array<i64: 8, 128>}]} {
    %c0_i32 = arith.constant 0 : i32
    %0 = arith.cmpi eq, %arg2, %c0_i32 : i32
    %1 = arith.extui %0 : i1 to i32
    %c0_i32_0 = arith.constant 0 : i32
    %2 = arith.cmpi ne, %1, %c0_i32_0 : i32
    scf.if %2 {
      %cst_10 = arith.constant 0.000000e+00 : f32
      %12 = vector.broadcast %cst_10 : f32 to vector<8x128xf32>
      %c0_11 = arith.constant 0 : index
      %c0_12 = arith.constant 0 : index
      %13 = vector.load %arg7[%c0_11, %c0_12] : memref<8x128xf32, #tpu.memory_space<vmem>>, vector<8x128xf32>
      tpu.vector_store %arg7[%c0_11, %c0_12], %12 {strides = array<i32>} : memref<8x128xf32, #tpu.memory_space<vmem>>, vector<8x128xf32>,
    } else {
    }
    %c0 = arith.constant 0 : index
    %c0_1 = arith.constant 0 : index
    %3 = vector.load %arg7[%c0, %c0_1] : memref<8x128xf32, #tpu.memory_space<vmem>>, vector<8x128xf32>
    %c0_2 = arith.constant 0 : index
    %c0_3 = arith.constant 0 : index
    %4 = vector.load %arg3[%c0_2, %c0_3] : memref<8x128xf32, #tpu.memory_space<vmem>>, vector<8x128xf32>
    %c0_4 = arith.constant 0 : index
    %c0_5 = arith.constant 0 : index
    %5 = vector.load %arg4[%c0_4, %c0_5] : memref<128x128xf32, #tpu.memory_space<vmem>>, vector<128x128xf32>
    %cst = arith.constant dense<0.000000e+00> : vector<8x128xf32>
    %6 = tpu.matmul %4, %5, %cst {dimension_numbers = #tpu.dot_dimension_numbers<[1], [1], [0], [0], [0, 0, 1, 0], [], []>} : vector<8x128xf32>, vector<128x128xf32>, vector<8x128xf32> -> vector<8x128xf32>
    %7 = arith.addf %3, %6 : vector<8x128xf32>
    %c0_6 = arith.constant 0 : index
    %c0_7 = arith.constant 0 : index
    %8 = vector.load %arg7[%c0_6, %c0_7] : memref<8x128xf32, #tpu.memory_space<vmem>>, vector<8x128xf32>
    tpu.vector_store %arg7[%c0_6, %c0_7], %7 {strides = array<i32>} : memref<8x128xf32, #tpu.memory_space<vmem>>, vector<8x128xf32>,
    %c0_i32_8 = arith.constant 0 : i32
    %9 = arith.cmpi eq, %arg2, %c0_i32_8 : i32
    %10 = arith.extui %9 : i1 to i32
    %c0_i32_9 = arith.constant 0 : i32
    %11 = arith.cmpi ne, %10, %c0_i32_9 : i32
    scf.if %11 {
      %c0_10 = arith.constant 0 : index
      %c0_11 = arith.constant 0 : index
      %12 = vector.load %arg7[%c0_10, %c0_11] : memref<8x128xf32, #tpu.memory_space<vmem>>, vector<8x128xf32>
      %c0_12 = arith.constant 0 : index
      %c0_13 = arith.constant 0 : index
      %13 = vector.load %arg5[%c0_12, %c0_13] : memref<1x128xf32, #tpu.memory_space<vmem>>, vector<1x128xf32>
      %14 = vector.broadcast %13 : vector<1x128xf32> to vector<8x128xf32>
      %15 = arith.addf %12, %14 : vector<8x128xf32>
      %c0_14 = arith.constant 0 : index
      %c0_15 = arith.constant 0 : index
      %16 = vector.load %arg6[%c0_14, %c0_15] : memref<8x128xf32, #tpu.memory_space<vmem>>, vector<8x128xf32>
      %17 = arith.mulf %15, %16 : vector<8x128xf32>
      %c0_16 = arith.constant 0 : index
      %c0_17 = arith.constant 0 : index
      %18 = vector.load %arg7[%c0_16, %c0_17] : memref<8x128xf32, #tpu.memory_space<vmem>>, vector<8x128xf32>
      tpu.vector_store %arg7[%c0_16, %c0_17], %17 {strides = array<i32>} : memref<8x128xf32, #tpu.memory_space<vmem>>, vector<8x128xf32>,
    } else {
    }
    return
  }
  func.func @transform_0(%arg0: i32, %arg1: i32, %arg2: i32) -> (i32, i32) {
    %c0_i32 = arith.constant 0 : i32
    return %arg1, %arg2 : i32, i32
  }
  func.func @transform_1(%arg0: i32, %arg1: i32, %arg2: i32) -> (i32, i32) {
    %c0_i32 = arith.constant 0 : i32
    return %arg0, %arg2 : i32, i32
  }
  func.func @transform_2(%arg0: i32, %arg1: i32, %arg2: i32) -> (i32, i32) {
    %c0_i32 = arith.constant 0 : i32
    %c0_i32_0 = arith.constant 0 : i32
    return %c0_i32, %arg0 : i32, i32
  }
  func.func @transform_3(%arg0: i32, %arg1: i32, %arg2: i32) -> (i32, i32) {
    %c0_i32 = arith.constant 0 : i32
    return %arg1, %arg0 : i32, i32
  }
  func.func @transform_4(%arg0: i32, %arg1: i32, %arg2: i32) -> (i32, i32) {
    %c0_i32 = arith.constant 0 : i32
    return %arg1, %arg0 : i32, i32
  }
}

</mosaic_0001>

<bundles_post_ra>
// kernel: conditional_linear.1
= control target key start
LH: loop header
LB: loop body
LE: loop exit
PB: predicated region body
PF: predicated region fallthrough
CT: control target
= control target key end

     0   :  { %v220_v1 = vmov 0.0   ;;  %vm221_vm0 = vmmov 0   ;;  %s308_s0 = inlined_call_operand.vmem [shape: f32[8,128], index: 0, kind: input, shape index: {}]   ;;  %s309_s1 = inlined_call_operand.vmem [shape: f32[128,128], index: 1, kind: input, shape index: {}]   ;;  %s310_s2 = inlined_call_operand.vmem [shape: f32[1,128], index: 2, kind: input, shape index: {}]   ;;  %s311_s3 = inlined_call_operand.vmem [shape: f32[8,128], index: 3, kind: input, shape index: {}]   ;;  %s312_s4 = inlined_call_operand.hbm [shape: f32[8,128], index: 4, kind: output, shape index: {}]  }
   0x1   :  { %v40_v0 = vld [vmem:[%s309_s1 + $0x78] sm:$0xff]  ;;  %160 = vmatprep.subr.mxu0 %v220_v1  ;;  %192 = vmatprep.mubr.msk.f32.mxu0 %vm221_vm0, %v220_v1  ;;  %v39_v2 = vld [vmem:[%s309_s1 + $0x70] sm:$0xff] }
   0x2   :  { %161 = vmatpush3.xpose.msra.mxu0 %v40_v0 }
   0x3   :  { %162 = vmatprep.subr.mxu0 %v220_v1 }
   0x4   :  { %9 = vsyncpa [#allocation3], 0  ;;  %v38_v3 = vld [vmem:[%s309_s1 + $0x68] sm:$0xff]  ;;  %v37_v4 = vld [vmem:[%s309_s1 + $0x60] sm:$0xff]  ;;  %s222_s27 = smov [#allocation2]  }
   0x5   :  { %v36_v5 = vld [vmem:[%s309_s1 + $0x58] sm:$0xff]  ;;  %v35_v6 = vld [vmem:[%s309_s1 + $0x50] sm:$0xff]  ;;  %v34_v7 = vld [vmem:[%s309_s1 + $0x48] sm:$0xff]  ;;  %s134_s28 = sshll.u32 %s222_s27, 4  ;;  %s135_s28 = int_to_ptr.vmem [resolvable:$true] %s134_s28 }
   0x6   :  { %163 = vmatpush3.xpose.msra.mxu0 %v39_v2  ;;  %v33_v8 = vld [vmem:[%s309_s1 + $0x40] sm:$0xff]  ;;  %v32_v9 = vld [vmem:[%s309_s1 + $0x38] sm:$0xff]  ;;  %v31_v10 = vld [vmem:[%s309_s1 + $0x30] sm:$0xff]  ;;  %p203_p1 = scmp.lt.s32.totalorder %s135_s28, %s135_s28 }
   0x7   :  { %164 = vmatprep.subr.mxu0 %v220_v1  ;;  %v30_v11 = vld [vmem:[%s309_s1 + $0x28] sm:$0xff]  ;;  %v29_v12 = vld [vmem:[%s309_s1 + $0x20] sm:$0xff]  ;;  %v28_v13 = vld [vmem:[%s309_s1 + $0x18] sm:$0xff] }
   0x8   :  { %v27_v14 = vld [vmem:[%s309_s1 + $0x10] sm:$0xff]  ;;  %v26_v15 = vld [vmem:[%s309_s1 + $0x8] sm:$0xff]  ;;  %v25_v16 = vld [vmem:[%s309_s1] sm:$0xff]  ;;  %s198_s1 = scalar_lea.vmem %s135_s28, 128 }
   0x9   :  { %v24_v17 = vld [vmem:[%s308_s0] sm:$0xff]  ;;  %p199_p0 = scmp.ne.s32.totalorder %s135_s28, %s198_s1  ;;  %p204_p2 = scmp.lt.s32.totalorder %s198_s1, %s198_s1 }
   0xa   :  { %165 = vmatpush3.xpose.msra.mxu0 %v38_v3  ;;  %v142_v19 = vld [vmem:[%s310_s2] ss:$0 sm:$0xff] }
   0xb   :  { %166 = vmatprep.subr.mxu0 %v220_v1  ;;  %v125_v21 = vld [vmem:[%s311_s3] sm:$0xff]  ;;  %p205_p3 = por %p204_p2, %p203_p1 }
   0xd   :  { %p206_p4 = pnand %p205_p3, %p199_p0 }
   0xe   :  { %167 = vmatpush3.xpose.msra.mxu0 %v37_v4 }
   0xf   :  { %168 = vmatprep.subr.mxu0 %v220_v1 }
  0x12   :  { %169 = vmatpush3.xpose.msra.mxu0 %v36_v5 }
  0x13   :  { %170 = vmatprep.subr.mxu0 %v220_v1 }
  0x16   :  { %171 = vmatpush3.xpose.msra.mxu0 %v35_v6 }
  0x17   :  { %172 = vmatprep.subr.mxu0 %v220_v1 }
  0x1a   :  { %173 = vmatpush3.xpose.msra.mxu0 %v34_v7 }
  0x1b   :  { %174 = vmatprep.subr.mxu0 %v220_v1 }
  0x1e   :  { %175 = vmatpush3.xpose.msra.mxu0 %v33_v8 }
  0x1f   :  { %176 = vmatprep.subr.mxu0 %v220_v1 }
  0x22   :  { %177 = vmatpush3.xpose.msra.mxu0 %v32_v9 }
  0x23   :  { %178 = vmatprep.subr.mxu0 %v220_v1 }
  0x26   :  { %179 = vmatpush3.xpose.msra.mxu0 %v31_v10 }
  0x27   :  { %180 = vmatprep.subr.mxu0 %v220_v1 }
  0x2a   :  { %181 = vmatpush3.xpose.msra.mxu0 %v30_v11 }
  0x2b   :  { %182 = vmatprep.subr.mxu0 %v220_v1 }
  0x2e   :  { %183 = vmatpush3.xpose.msra.mxu0 %v29_v12 }
  0x2f   :  { %184 = vmatprep.subr.mxu0 %v220_v1 }
  0x32   :  { %185 = vmatpush3.xpose.msra.mxu0 %v28_v13 }
  0x33   :  { %186 = vmatprep.subr.mxu0 %v220_v1 }
  0x36   :  { %187 = vmatpush3.xpose.msra.mxu0 %v27_v14 }
  0x37   :  { %188 = vmatprep.subr.mxu0 %v220_v1 }
  0x3a   :  { %189 = vmatpush3.xpose.msra.mxu0 %v26_v15 }
  0x3b   :  { %190 = vmatprep.subr.mxu0 %v220_v1 }
  0x3e   :  { %191 = vmatpush3.xpose.msra.mxu0 %v25_v16 }
  0x41   :  { %193 = vmatmul.mubr.f32.vlgmr.msra.gmra.mxu0 %v24_v17 }
 0x101   :  { %v107_v18 = vpop.f32.mrf.mxu0 }
 0x102   :  { %v124_v22 = vadd.f32 %v142_v19, %v107_v18 }
 0x103   :  { %v194_v20 = vpop.f32.mrf.mxu0 }
 0x104   :  { %v126_v23 = vmul.f32 %v125_v21, %v124_v22 }
 0x106   :  { %127 = vst [vmem:[#allocation2] sm:$0xff] %v126_v23 }
 0x107   :  { %209 = shalt.err (!%p206_p4)
}
 0x108   :  { %137 = dma.vmem_to_hbm [thread:$0]  %s135_s28, 128, %s312_s4, [#allocation3]  }
 0x109   :  { %218 = dma.done.wait [#allocation3], 128  }
 0x10a   :  { %219 = vsyncadd [#allocation3], 4294967168 }
 0x10b   :  { %141 = vsyncpa [#allocation3], 1 }

</bundles_post_ra>
